<compile_context>
chip_gen: v6e
topology: v6e:2x2x1
jax: 0.10.0
libtpu: 0.0.40
codegen_flags: <defaults>
</compile_context>

<pallas_src>
import functools

import jax
import jax.numpy as jnp
import numpy as np
from jax.experimental import pallas as pl
from jax.experimental.pallas import tpu as pltpu


# ----------------------------------------------------------------------------
# Pallas kernel: ragged AttenFusion hot path.
# Only the ego row of the per-pixel scaled-dot-product attention survives the
# final `[0]` slice in AttenFusion.forward, so per pixel p:
#   score[n] = <x[0,:,p], x[n,:,p]> / sqrt(C)
#   attn     = softmax_n(score)   over the N valid agents of this batch
#   out[c,p] = sum_n attn[n] * x[n,c,p]
# Grid = (B, HW_tiles, max_N); the agent axis is an "arbitrary" accumulation
# axis, state is carried in VMEM scratch (flash-attention style).
# ----------------------------------------------------------------------------
def _atten_fuse_kernel(off_ref, nv_ref, x_ref, o_ref,
                       q0_sc, acc_sc, m_sc, d_sc, *, inv_sqrt_dim):
    b = pl.program_id(0)
    n = pl.program_id(2)
    n_valid = nv_ref[b]

    @pl.when(n == 0)
    def _init():
        q0 = x_ref[...].astype(jnp.float32)                  # (C, T) ego plane
        q0_sc[...] = q0
        acc_sc[...] = q0                                      # exp(s0 - s0) * x0
        m_sc[...] = jnp.sum(q0 * q0, axis=0, keepdims=True) * inv_sqrt_dim
        d_sc[...] = jnp.ones(d_sc.shape, d_sc.dtype)          # exp(s0 - s0) = 1

    @pl.when((n > 0) & (n < n_valid))
    def _update():
        xn = x_ref[...].astype(jnp.float32)                   # (C, T) agent plane
        q0 = q0_sc[...]
        s = jnp.sum(q0 * xn, axis=0, keepdims=True) * inv_sqrt_dim
        m_prev = m_sc[...]
        m_new = jnp.maximum(m_prev, s)
        alpha = jnp.exp(m_prev - m_new)
        e = jnp.exp(s - m_new)
        d_sc[...] = alpha * d_sc[...] + e
        acc_sc[...] = alpha * acc_sc[...] + e * xn
        m_sc[...] = m_new

    @pl.when(n == pl.num_programs(2) - 1)
    def _finalize():
        o_ref[...] = (acc_sc[...] *
                      pl.reciprocal(d_sc[...], approx=False)).astype(o_ref.dtype)


def _pick_lane_tile(HW, C, B, in_item, out_item, vmem_block_budget):
    """Largest multiple-of-128 lane tile T such that
       * the double-buffered input/output blocks + f32 scratch + live f32
         temporaries fit the block budget (conservative for v5e/v6e/v7x),
       * T <= 1024 for small C (vreg pressure), <= 2048 otherwise,
       * T divides HW when HW is a 128-multiple (no pad, no post-slice),
       * the parallel grid product B * ceil(HW/T) stays >= 2 (v7x megacore)."""
    # per-lane bytes: 2x input buf + 2x output buf + q0/acc scratch + ~4 live f32
    per_lane = C * (2 * in_item + 2 * out_item + 2 * 4 + 4 * 4) + 64
    t_max = max(128, (vmem_block_budget // per_lane) // 128 * 128)
    t_max = min(t_max, 2048 if C >= 32 else 1024)
    if HW >= 128 and HW % 128 == 0:
        divisors = [t for t in range(128, min(t_max, HW) + 1, 128) if HW % t == 0]
        for t in reversed(divisors):                 # largest first
            if B * (HW // t) >= 2:
                return t
        return divisors[-1]                          # single-tile case (tiny map)
    hw128 = ((HW + 127) // 128) * 128
    t = int(min(t_max, hw128))
    while t > 128 and B * ((HW + t - 1) // t) < 2:
        t -= 128
    return t


def atten_fusion_ragged(x_warped, record_len, *, out_dtype=None,
                        vmem_block_budget=12 << 20, vmem_limit_bytes=32 << 20):
    """x_warped: (sum(record_len), C, H, W) warped features, already in the
    desired storage dtype.  record_len: static python ints.  Returns (B,C,H,W)."""
    total, C, H, W = x_warped.shape
    HW = H * W
    record_len = [int(n) for n in record_len]
    B = len(record_len)
    assert min(record_len) >= 1, "every sample needs at least the ego agent"
    assert sum(record_len) == total
    Lg = max(record_len)                             # grid extent on agent axis
    if out_dtype is None:
        out_dtype = x_warped.dtype

    in_item = jnp.dtype(x_warped.dtype).itemsize
    out_item = jnp.dtype(out_dtype).itemsize
    T = _pick_lane_tile(HW, C, B, in_item, out_item, vmem_block_budget)
    HWp = ((HW + T - 1) // T) * T

    x2 = x_warped.reshape(total, C, HW)              # free reshape (view)
    if HWp != HW:
        x2 = jnp.pad(x2, ((0, 0), (0, 0), (0, HWp - HW)))

    offsets = np.concatenate([[0], np.cumsum(record_len)[:-1]])
    off = jnp.asarray(offsets, jnp.int32)            # (B,) start row per batch
    nv = jnp.asarray(record_len, jnp.int32)          # (B,) valid agent count

    out = pl.pallas_call(
        functools.partial(_atten_fuse_kernel,
                          inv_sqrt_dim=float(1.0 / np.sqrt(C))),
        out_shape=jax.ShapeDtypeStruct((B, C, HWp), out_dtype),
        grid_spec=pltpu.PrefetchScalarGridSpec(
            num_scalar_prefetch=2,
            grid=(B, HWp // T, Lg),
            in_specs=[pl.BlockSpec(
                (None, C, T),
                # clamp dead-agent steps to the last valid row: block index is
                # unchanged -> the pipeliner skips the re-DMA; compute skipped
                # by pl.when inside the kernel.
                lambda b, j, n, off, nv: (off[b] + jnp.minimum(n, nv[b] - 1), 0, j))],
            out_specs=pl.BlockSpec(
                (None, C, T),
                lambda b, j, n, off, nv: (b, 0, j)),
            scratch_shapes=[pltpu.VMEM((C, T), jnp.float32),   # q0 (ego plane)
                            pltpu.VMEM((C, T), jnp.float32),   # acc
                            pltpu.VMEM((1, T), jnp.float32),   # running max
                            pltpu.VMEM((1, T), jnp.float32)],  # denom
        ),
        compiler_params=pltpu.CompilerParams(
            dimension_semantics=("parallel", "parallel", "arbitrary"),
            vmem_limit_bytes=vmem_limit_bytes),
    )(off, nv, x2)

    if HWp != HW:
        out = out[:, :, :HW]
    return out.reshape(B, C, H, W)


# ----------------------------------------------------------------------------
# warp_affine_simple: F.affine_grid + F.grid_sample (bilinear, zeros padding,
# align_corners=False — the PyTorch defaults).  Plain-JAX glue; index math is
# shared, the 4 bilinear taps use a single fused gather, all agents (over all
# batches) are warped in one call, and the storage-dtype cast is fused in.
# ----------------------------------------------------------------------------
def warp_affine_simple(src, M, dsize, out_dtype=None):
    N, C, H, W = src.shape
    Ho, Wo = dsize
    if out_dtype is None:
        out_dtype = src.dtype

    xs = (2.0 * (jnp.arange(Wo, dtype=jnp.float32) + 0.5) / Wo) - 1.0
    ys = (2.0 * (jnp.arange(Ho, dtype=jnp.float32) + 0.5) / Ho) - 1.0
    gx, gy = jnp.meshgrid(xs, ys)                           # (Ho, Wo)
    base = jnp.stack([gx, gy, jnp.ones_like(gx)], -1)       # (Ho, Wo, 3)

    coords = jnp.einsum("nij,hwj->nhwi", M.astype(jnp.float32), base)   # (N,Ho,Wo,2)
    ix = ((coords[..., 0] + 1.0) * W - 1.0) / 2.0
    iy = ((coords[..., 1] + 1.0) * H - 1.0) / 2.0

    x0 = jnp.floor(ix)
    y0 = jnp.floor(iy)
    x1 = x0 + 1.0
    y1 = y0 + 1.0
    wx1 = ix - x0
    wx0 = 1.0 - wx1
    wy1 = iy - y0
    wy0 = 1.0 - wy1

    def clip_valid(xi, yi):
        valid = ((xi >= 0) & (xi <= W - 1) & (yi >= 0) & (yi <= H - 1)
                 ).astype(jnp.float32)
        xc = jnp.clip(xi, 0, W - 1).astype(jnp.int32)
        yc = jnp.clip(yi, 0, H - 1).astype(jnp.int32)
        return yc * W + xc, valid

    i00, v00 = clip_valid(x0, y0)
    i10, v10 = clip_valid(x1, y0)
    i01, v01 = clip_valid(x0, y1)
    i11, v11 = clip_valid(x1, y1)

    flat = src.astype(jnp.float32).reshape(N, C, H * W)
    idx = jnp.stack([i00, i10, i01, i11], axis=1).reshape(N, 1, 4 * Ho * Wo)
    g = jnp.take_along_axis(flat, idx, axis=2).reshape(N, C, 4, Ho, Wo)

    wts = jnp.stack([(wx0 * wy0) * v00, (wx1 * wy0) * v10,
                     (wx0 * wy1) * v01, (wx1 * wy1) * v11], axis=1)
    return jnp.sum(g * wts[:, None], axis=2).astype(out_dtype)   # (N, C, Ho, Wo)


# ----------------------------------------------------------------------------
# SCOPE forward (non-multi-scale, communication=False, agg_mode='ATTEN').
# AttenFusion / MaxFusion have no learnable parameters, so nothing to init.
# TODO(synk): multi-scale / backbone / Communication / Deform branches are not
#             implemented (their module code is not part of this spec).
# ----------------------------------------------------------------------------
def _normalize_t(pairwise_t_matrix, H, W, downsample_rate, voxel_size0):
    t = pairwise_t_matrix[:, :, :, (0, 1), :][:, :, :, :, (0, 1, 3)]
    t = t.at[..., 0, 1].multiply(H / W)
    t = t.at[..., 1, 0].multiply(W / H)
    t = t.at[..., 0, 2].set(t[..., 0, 2] / (downsample_rate * voxel_size0 * W) * 2)
    t = t.at[..., 1, 2].set(t[..., 1, 2] / (downsample_rate * voxel_size0 * H) * 2)
    return t


def scope_forward(x, rm, record_len, pairwise_t_matrix, *,
                  voxel_size0, downsample_rate,
                  storage_dtype=None, out_dtype=None):
    _, C, H, W = x.shape
    B, L = pairwise_t_matrix.shape[:2]
    record_len = [int(n) for n in record_len]            # static python ints
    assert min(record_len) >= 1

    t = _normalize_t(pairwise_t_matrix, H, W, downsample_rate, voxel_size0)
    communication_rates = jnp.array(0)

    # bf16 streams halve HBM traffic for the (mem-bound) attention kernel, but
    # only when C is at least a native bf16 sublane group (perf-review item 12).
    if storage_dtype is None:
        storage_dtype = jnp.bfloat16 if C >= 16 else x.dtype

    # One fused warp over every agent of every batch: the transform applied to
    # agent i of batch b is t[b, 0, i] — concatenate them in record order so no
    # per-batch slicing / stacking of the feature tensor is needed.
    M_all = jnp.concatenate([t[b, 0, :record_len[b]] for b in range(B)], axis=0)
    warped = warp_affine_simple(x, M_all, (H, W), out_dtype=storage_dtype)

    x_fuse = atten_fusion_ragged(warped, record_len,
                                 out_dtype=out_dtype or x.dtype)     # (B, C, H, W)
    return x_fuse, communication_rates, {}


# ----------------------------------------------------------------------------
if __name__ == "__main__":
    key = jax.random.PRNGKey(0)
    k1, k2, k3, k4, k5 = jax.random.split(key, 5)

    B = 2
    L = 5                       # max_cav
    record_len = [2, 3]         # agents per sample
    total = sum(record_len)
    C, H, W = 8, 16, 16
    voxel_size0 = 0.4
    downsample_rate = 2

    x = jax.random.normal(k1, (total, C, H, W), dtype=jnp.float32)
    rm = jax.random.normal(k2, (total, 2, H, W), dtype=jnp.float32)  # unused (no comm)

    # Build pairwise_t_matrix (B, L, L, 4, 4): small rotation + translation.
    angles = 0.05 * jax.random.normal(k3, (B, L, L), dtype=jnp.float32)
    tx = 0.5 * jax.random.normal(k4, (B, L, L), dtype=jnp.float32)
    ty = 0.5 * jax.random.normal(k5, (B, L, L), dtype=jnp.float32)
    c, s = jnp.cos(angles), jnp.sin(angles)
    z, o = jnp.zeros_like(c), jnp.ones_like(c)
    row0 = jnp.stack([c, -s, z, tx], -1)
    row1 = jnp.stack([s, c, z, ty], -1)
    row2 = jnp.stack([z, z, o, z], -1)
    row3 = jnp.stack([z, z, z, o], -1)
    pairwise_t_matrix = jnp.stack([row0, row1, row2, row3], axis=-2)  # (B,L,L,4,4)

    out, comm_rate, _ = scope_forward(
        x, rm, record_len, pairwise_t_matrix,
        voxel_size0=voxel_size0, downsample_rate=downsample_rate)
    jax.block_until_ready(out)
    assert out.shape == (B, C, H, W)

    # ---- plain-JAX reference of AttenFusion (same warp) for a sanity check ----
    def atten_ref(neighbor):
        N_, C_, H_, W_ = neighbor.shape
        xx = neighbor.reshape(N_, C_, -1).transpose(2, 0, 1)          # (HW, N, C)
        score = jnp.einsum("pnc,pmc->pnm", xx, xx) / np.sqrt(C_)
        attn = jax.nn.softmax(score, axis=-1)
        ctx = jnp.einsum("pnm,pmc->pnc", attn, xx)
        return ctx.transpose(1, 2, 0).reshape(N_, C_, H_ * W_).reshape(N_, C_, H_, W_)[0]

    t_ref = _normalize_t(pairwise_t_matrix, H, W, downsample_rate, voxel_size0)
    offs = np.concatenate([[0], np.cumsum(np.asarray(record_len))])
    refs = []
    for b in range(B):
        N = int(record_len[b])
        nb = warp_affine_simple(x[offs[b]:offs[b + 1]], t_ref[b, 0, :N], (H, W))
        refs.append(atten_ref(nb))
    ref = jnp.stack(refs)
    np.testing.assert_allclose(np.asarray(out), np.asarray(ref), rtol=1e-3, atol=1e-3)

    print("KERNEL_OK")
</pallas_src>

<mosaic_0001>
module attributes {stable_mosaic.version = 11 : i64} {
  func.func @_atten_fuse_kernel(%arg0: i32, %arg1: i32, %arg2: i32, %arg3: memref<2xi32, #tpu.memory_space<smem>>, %arg4: memref<2xi32, #tpu.memory_space<smem>>, %arg5: memref<1x8x256xf32, #tpu.memory_space<vmem>>, %arg6: memref<1x8x256xf32, #tpu.memory_space<vmem>>, %arg7: memref<8x256xf32, #tpu.memory_space<vmem>>, %arg8: memref<8x256xf32, #tpu.memory_space<vmem>>, %arg9: memref<1x256xf32, #tpu.memory_space<vmem>>, %arg10: memref<1x256xf32, #tpu.memory_space<vmem>>) attributes {dimension_semantics = [#tpu.dimension_semantics<parallel>, #tpu.dimension_semantics<parallel>, #tpu.dimension_semantics<arbitrary>], iteration_bounds = array<i64: 2, 1, 3>, scalar_prefetch = 2 : i64, scratch_operands = 4 : i64, tpu.core_type = #tpu.core_type<tc>, window_params = [{transform_indices = @transform_0, window_bounds = array<i64: 1, 8, 256>}, {transform_indices = @transform_1, window_bounds = array<i64: 1, 8, 256>}]} {
    %0 = arith.index_cast %arg0 : i32 to index
    %1 = memref.load %arg4[%0] : memref<2xi32, #tpu.memory_space<smem>>
    %c0_i32 = arith.constant 0 : i32
    %2 = arith.cmpi eq, %arg2, %c0_i32 : i32
    %3 = arith.extui %2 : i1 to i32
    %c0_i32_0 = arith.constant 0 : i32
    %4 = arith.cmpi ne, %3, %c0_i32_0 : i32
    scf.if %4 {
      %c0 = arith.constant 0 : index
      %c0_4 = arith.constant 0 : index
      %c0_5 = arith.constant 0 : index
      %13 = vector.load %arg5[%c0, %c0_4, %c0_5] : memref<1x8x256xf32, #tpu.memory_space<vmem>>, vector<1x8x256xf32>
      %14 = vector.shape_cast %13 : vector<1x8x256xf32> to vector<8x256xf32>
      %c0_6 = arith.constant 0 : index
      %c0_7 = arith.constant 0 : index
      %15 = vector.load %arg7[%c0_6, %c0_7] : memref<8x256xf32, #tpu.memory_space<vmem>>, vector<8x256xf32>
      tpu.vector_store %arg7[%c0_6, %c0_7], %14 {strides = array<i32>} : memref<8x256xf32, #tpu.memory_space<vmem>>, vector<8x256xf32>,
      %c0_8 = arith.constant 0 : index
      %c0_9 = arith.constant 0 : index
      %16 = vector.load %arg8[%c0_8, %c0_9] : memref<8x256xf32, #tpu.memory_space<vmem>>, vector<8x256xf32>
      tpu.vector_store %arg8[%c0_8, %c0_9], %14 {strides = array<i32>} : memref<8x256xf32, #tpu.memory_space<vmem>>, vector<8x256xf32>,
      %17 = arith.mulf %14, %14 : vector<8x256xf32>
      %cst = arith.constant dense<0.000000e+00> : vector<256xf32>
      %18 = vector.multi_reduction <add>, %17, %cst [0] : vector<8x256xf32> to vector<256xf32>
      %19 = vector.shape_cast %18 : vector<256xf32> to vector<1x256xf32>
      %cst_10 = arith.constant 0.353553385 : f32
      %20 = vector.broadcast %cst_10 : f32 to vector<1x256xf32>
      %21 = arith.mulf %19, %20 : vector<1x256xf32>
      %c0_11 = arith.constant 0 : index
      %c0_12 = arith.constant 0 : index
      %22 = vector.load %arg9[%c0_11, %c0_12] : memref<1x256xf32, #tpu.memory_space<vmem>>, vector<1x256xf32>
      tpu.vector_store %arg9[%c0_11, %c0_12], %21 {strides = array<i32>} : memref<1x256xf32, #tpu.memory_space<vmem>>, vector<1x256xf32>,
      %cst_13 = arith.constant 1.000000e+00 : f32
      %23 = vector.broadcast %cst_13 : f32 to vector<1x256xf32>
      %c0_14 = arith.constant 0 : index
      %c0_15 = arith.constant 0 : index
      %24 = vector.load %arg10[%c0_14, %c0_15] : memref<1x256xf32, #tpu.memory_space<vmem>>, vector<1x256xf32>
      tpu.vector_store %arg10[%c0_14, %c0_15], %23 {strides = array<i32>} : memref<1x256xf32, #tpu.memory_space<vmem>>, vector<1x256xf32>,
    } else {
    }
    %c0_i32_1 = arith.constant 0 : i32
    %5 = arith.cmpi sgt, %arg2, %c0_i32_1 : i32
    %6 = arith.cmpi slt, %arg2, %1 : i32
    %7 = arith.andi %5, %6 : i1
    %8 = arith.extui %7 : i1 to i32
    %c0_i32_2 = arith.constant 0 : i32
    %9 = arith.cmpi ne, %8, %c0_i32_2 : i32
    scf.if %9 {
      %c0 = arith.constant 0 : index
      %c0_4 = arith.constant 0 : index
      %c0_5 = arith.constant 0 : index
      %13 = vector.load %arg5[%c0, %c0_4, %c0_5] : memref<1x8x256xf32, #tpu.memory_space<vmem>>, vector<1x8x256xf32>
      %14 = vector.shape_cast %13 : vector<1x8x256xf32> to vector<8x256xf32>
      %c0_6 = arith.constant 0 : index
      %c0_7 = arith.constant 0 : index
      %15 = vector.load %arg7[%c0_6, %c0_7] : memref<8x256xf32, #tpu.memory_space<vmem>>, vector<8x256xf32>
      %16 = arith.mulf %15, %14 : vector<8x256xf32>
      %cst = arith.constant dense<0.000000e+00> : vector<256xf32>
      %17 = vector.multi_reduction <add>, %16, %cst [0] : vector<8x256xf32> to vector<256xf32>
      %18 = vector.shape_cast %17 : vector<256xf32> to vector<1x256xf32>
      %cst_8 = arith.constant 0.353553385 : f32
      %19 = vector.broadcast %cst_8 : f32 to vector<1x256xf32>
      %20 = arith.mulf %18, %19 : vector<1x256xf32>
      %c0_9 = arith.constant 0 : index
      %c0_10 = arith.constant 0 : index
      %21 = vector.load %arg9[%c0_9, %c0_10] : memref<1x256xf32, #tpu.memory_space<vmem>>, vector<1x256xf32>
      %22 = arith.maximumf %21, %20 : vector<1x256xf32>
      %23 = arith.subf %21, %22 : vector<1x256xf32>
      %24 = math.exp %23 : vector<1x256xf32>
      %25 = arith.subf %20, %22 : vector<1x256xf32>
      %26 = math.exp %25 : vector<1x256xf32>
      %c0_11 = arith.constant 0 : index
      %c0_12 = arith.constant 0 : index
      %27 = vector.load %arg10[%c0_11, %c0_12] : memref<1x256xf32, #tpu.memory_space<vmem>>, vector<1x256xf32>
      %28 = arith.mulf %24, %27 : vector<1x256xf32>
      %29 = arith.addf %28, %26 : vector<1x256xf32>
      %c0_13 = arith.constant 0 : index
      %c0_14 = arith.constant 0 : index
      %30 = vector.load %arg10[%c0_13, %c0_14] : memref<1x256xf32, #tpu.memory_space<vmem>>, vector<1x256xf32>
      tpu.vector_store %arg10[%c0_13, %c0_14], %29 {strides = array<i32>} : memref<1x256xf32, #tpu.memory_space<vmem>>, vector<1x256xf32>,
      %c0_15 = arith.constant 0 : index
      %c0_16 = arith.constant 0 : index
      %31 = vector.load %arg8[%c0_15, %c0_16] : memref<8x256xf32, #tpu.memory_space<vmem>>, vector<8x256xf32>
      %32 = vector.broadcast %24 : vector<1x256xf32> to vector<8x256xf32>
      %33 = arith.mulf %32, %31 : vector<8x256xf32>
      %34 = vector.broadcast %26 : vector<1x256xf32> to vector<8x256xf32>
      %35 = arith.mulf %34, %14 : vector<8x256xf32>
      %36 = arith.addf %33, %35 : vector<8x256xf32>
      %c0_17 = arith.constant 0 : index
      %c0_18 = arith.constant 0 : index
      %37 = vector.load %arg8[%c0_17, %c0_18] : memref<8x256xf32, #tpu.memory_space<vmem>>, vector<8x256xf32>
      tpu.vector_store %arg8[%c0_17, %c0_18], %36 {strides = array<i32>} : memref<8x256xf32, #tpu.memory_space<vmem>>, vector<8x256xf32>,
      %c0_19 = arith.constant 0 : index
      %c0_20 = arith.constant 0 : index
      %38 = vector.load %arg9[%c0_19, %c0_20] : memref<1x256xf32, #tpu.memory_space<vmem>>, vector<1x256xf32>
      tpu.vector_store %arg9[%c0_19, %c0_20], %22 {strides = array<i32>} : memref<1x256xf32, #tpu.memory_space<vmem>>, vector<1x256xf32>,
    } else {
    }
    %c2_i32 = arith.constant 2 : i32
    %10 = arith.cmpi eq, %arg2, %c2_i32 : i32
    %11 = arith.extui %10 : i1 to i32
    %c0_i32_3 = arith.constant 0 : i32
    %12 = arith.cmpi ne, %11, %c0_i32_3 : i32
    scf.if %12 {
      %c0 = arith.constant 0 : index
      %c0_4 = arith.constant 0 : index
      %13 = vector.load %arg8[%c0, %c0_4] : memref<8x256xf32, #tpu.memory_space<vmem>>, vector<8x256xf32>
      %c0_5 = arith.constant 0 : index
      %c0_6 = arith.constant 0 : index
      %14 = vector.load %arg10[%c0_5, %c0_6] : memref<1x256xf32, #tpu.memory_space<vmem>>, vector<1x256xf32>
      %15 = tpu.reciprocal %14 : vector<1x256xf32> -> vector<1x256xf32>
      %16 = vector.broadcast %15 : vector<1x256xf32> to vector<8x256xf32>
      %17 = arith.mulf %13, %16 : vector<8x256xf32>
      %c0_7 = arith.constant 0 : index
      %c0_8 = arith.constant 0 : index
      %c0_9 = arith.constant 0 : index
      %18 = vector.load %arg6[%c0_7, %c0_8, %c0_9] : memref<1x8x256xf32, #tpu.memory_space<vmem>>, vector<1x8x256xf32>
      %19 = vector.shape_cast %18 : vector<1x8x256xf32> to vector<8x256xf32>
      %20 = vector.shape_cast %17 : vector<8x256xf32> to vector<1x8x256xf32>
      tpu.vector_store %arg6[%c0_7, %c0_8, %c0_9], %20 {strides = array<i32>} : memref<1x8x256xf32, #tpu.memory_space<vmem>>, vector<1x8x256xf32>,
    } else {
    }
    return
  }
  func.func @transform_0(%arg0: i32, %arg1: i32, %arg2: i32, %arg3: memref<2xi32, #tpu.memory_space<smem>>, %arg4: memref<2xi32, #tpu.memory_space<smem>>) -> (i32, i32, i32) {
    %0 = arith.index_cast %arg0 : i32 to index
    %1 = memref.load %arg3[%0] : memref<2xi32, #tpu.memory_space<smem>>
    %2 = arith.index_cast %arg0 : i32 to index
    %3 = memref.load %arg4[%2] : memref<2xi32, #tpu.memory_space<smem>>
    %c1_i32 = arith.constant 1 : i32
    %4 = arith.subi %3, %c1_i32 : i32
    %5 = arith.minsi %arg2, %4 : i32
    %6 = arith.addi %1, %5 : i32
    %c0_i32 = arith.constant 0 : i32
    %c0_i32_0 = arith.constant 0 : i32
    return %6, %c0_i32, %arg1 : i32, i32, i32
  }
  func.func @transform_1(%arg0: i32, %arg1: i32, %arg2: i32, %arg3: memref<2xi32, #tpu.memory_space<smem>>, %arg4: memref<2xi32, #tpu.memory_space<smem>>) -> (i32, i32, i32) {
    %c0_i32 = arith.constant 0 : i32
    %c0_i32_0 = arith.constant 0 : i32
    return %arg0, %c0_i32, %arg1 : i32, i32, i32
  }
}

</mosaic_0001>

<bundles_post_ra>
// kernel: tpu_custom_call.1
= control target key start
LH: loop header
LB: loop body
LE: loop exit
PB: predicated region body
PF: predicated region fallthrough
CT: control target
= control target key end

     0   :  { %s815_s12 = smov [#allocation7]   ;;  %s1090_s0 = inlined_call_operand.hbm [shape: s32[2], index: 0, kind: input, shape index: {}]   ;;  %s1091_s2 = inlined_call_operand.hbm [shape: f32[5,8,256], index: 2, kind: input, shape index: {}]   ;;  %s1092_s3 = inlined_call_operand.hbm [shape: f32[2,8,256], index: 3, kind: output, shape index: {}]   ;;  %s1093_s1 = inlined_call_operand.vmem [shape: s32[2], index: 1, kind: input, shape index: {}]  }
   0x1   :  { %9 = dma.hbm_to_smem %s1090_s0, 16, %s815_s12, [#allocation6] }
   0x2   :  { %s10_s17 = sshll.u32 %s1093_s1, 4  ;;  %s11_s17 = int_to_ptr.vmem [resolvable:$true] %s10_s17 }
   0x3   :  { %s651_s18 = scalar_lea.vmem %s11_s17, 16  ;;  %p656_p1 = scmp.lt.s32.totalorder %s11_s17, %s11_s17 }
   0x4   :  { %p652_p0 = scmp.ne.s32.totalorder %s11_s17, %s651_s18  ;;  %p657_p2 = scmp.lt.s32.totalorder %s651_s18, %s651_s18 }
   0x6   :  { %p658_p3 = por %p657_p2, %p656_p1 }
   0x8   :  { %p659_p4 = pnand %p658_p3, %p652_p0 }
   0xa   :  { %662 = shalt.err (!%p659_p4)  }
   0xb   :  { %s816_s19 = smov [#allocation8]  }
   0xc   :  { %13 = dma.vmem_to_smem %s11_s17, 16, %s816_s19, [#allocation6] }
   0xd   :  { %761 = dma.done.wait [#allocation6], 32 }
   0xe   :  { %762 = vsyncadd [#allocation6], 4294967264 }
   0xf   :  { %15 = sfence }
  0x10   :  { %16 = vsyncpa [#allocation10], 0 }
  0x11   :  { %18 = vsyncpa [#allocation10 + $0x1], 0 }
  0x12   :  { %19 = vsyncpa [#allocation11], 0 }
  0x13   :  { %21 = vsyncpa [#allocation11 + $0x1], 0  ;;  %s848_s0 = smov 0   ;;  %s850_s1 = smov 0  }
  0x14   :  { %s852_s20 = smov 0   ;;  %s854_s21 = smov 0  }
  0x15   :  { %s856_s22 = smov 0   ;;  %s858_s23 = smov 0  }
  0x16   :  { %s860_s24 = smov 0   ;;  %s862_s25 = smov 0  }
  0x17   :  { %s864_s26 = smov 0   ;;  %s866_s27 = smov 0  }
  0x18   :  { %s868_s28 = smov 0  }
  0x19 LB: > { %1101 = sst [smem:[#allocation20_spill]] %s781_s20  ;;  %s498_s29 = sadd.s32 4294967295, %s813_s28   ;;  %s813_s28 = sphi %s868_s28, %s27_s28   ;;  %s809_s27 = sphi %s866_s27, %s1127_s27   ;;  %s805_s26 = sphi %s864_s26, %s1133_s26   ;;  %s801_s25 = sphi %s862_s25, %s1125_s25   ;;  %s797_s24 = sphi %s860_s24, %s1132_s24   ;;  %s793_s23 = sphi %s858_s23, %s1124_s23   ;;  %s789_s22 = sphi %s856_s22, %s1131_s22   ;;  %s785_s21 = sphi %s854_s21, %s1130_s21   ;;  %s781_s20 = sphi %s852_s20, %s1122_s20   ;;  %s777_s1 = sphi %s850_s1, %s1129_s1   ;;  %s773_s0 = sphi %s848_s0, %s1128_s0  }
  0x1a   : > { %1102 = sst [smem:[#allocation21_spill]] %s793_s23  ;;  %s39_s30 = sadd.s32 1, %s805_s26 }
  0x1b   : > { %1103 = sst [smem:[#allocation22_spill]] %s809_s27  ;;  %p40_p5 = scmp.ge.s32.totalorder %s39_s30, 3 }
  0x1c   : > { %s46_s4 = sadd.s32 1, %s809_s27  ;;  %s499_s5 = sadd.s32 4294967294, %s813_s28  }
  0x1d   : > { %s51_s6 = sld [smem:[#allocation8 + %s809_s27]]  ;;  %s1135_s30 = smov (%p40_p5, %s39_s30), 0 }
  0x1e   : > { %1104 = sst [smem:[#allocation23_spill]] %s1135_s30  ;;  %s1137_s4 = smov (!%p40_p5, %s46_s4), %s809_s27 }
  0x1f   : > { %s910_s7 = sld [smem:[#allocation7 + %s809_s27]]  ;;  %p74_p6 = scmp.ne.s32.totalorder %s793_s23, %s789_s22 }
  0x20   : > { %p48_p7 = scmp.ge.s32.totalorder %s1137_s4, 2  ;;  %p80_p8 = scmp.ne.s32.totalorder %s789_s22, %s785_s21 }
  0x21   : > { %p75_p9 = scmp.eq.s32.totalorder %s813_s28, 0  ;;  %p81_p10 = scmp.eq.s32.totalorder %s498_s29, 0 }
  0x22   : > { %s1139_s4 = smov (%p48_p7, %s1137_s4), 0  ;;  %s95_s14 = sadd.s32 1, %s781_s20 }
  0x23   : > { %1105 = sst [smem:[#allocation24_spill]] %s1139_s4  ;;  %s500_s8 = sadd.s32 4294967295, %s51_s6 }
  0x24   : > { %p918_p11 = por %p81_p10, %p80_p8  ;;  %p53_p12 = scmp.lt.s32.totalorder %s805_s26, %s500_s8 }
  0x25   : > { %s56_s10 = sld [smem:[#allocation7 + %s1139_s4]]  ;;  %s90_s12 = ssub.s32 %s809_s27, %s1139_s4 }
  0x26   : > { %s1106_s9 = scalar_select %p918_p11, 1, 0 }
  0x27   : > { %s57_s11 = sld [smem:[#allocation8 + %s1139_s4]]  ;;  %p93_p13 = scmp.eq.s32.totalorder %s90_s12, 0 }
  0x28   : > { %s54_s13 = scalar_select %p53_p12, %s805_s26, %s500_s8 }
  0x29   : > { %p105_p0 = scmp.ne.s32.totalorder %s781_s20, %s777_s1  ;;  %p106_p1 = scmp.eq.s32.totalorder %s498_s29, 5 }
  0x2a   : > { %s55_s15 = sadd.s32 %s54_s13, %s910_s7  ;;  %p111_p2 = scmp.ne.s32.totalorder %s777_s1, %s773_s0 }
  0x2b   : > { %s933_s16 = scalar_select %p93_p13, %s781_s20, %s95_s14  }
  0x2c   : > { %p112_p3 = scmp.eq.s32.totalorder %s499_s5, 5  ;;  %p938_p5 = por %p106_p1, %p105_p0 }
  0x2d   : > { %1107 = sst [smem:[#allocation25_spill]] %s933_s16  ;;  %s501_s17 = sadd.s32 4294967295, %s57_s11 }
  0x2e   : > { %p59_p4 = scmp.lt.s32.totalorder %s1135_s30, %s501_s17  ;;  %p942_p7 = por %p112_p3, %p111_p2 }
  0x2f   : > { %s1108_s18 = scalar_select %p938_p5, 1, 0 }
  0x30   : > { %s1109_s19 = scalar_select %p942_p7, 1, 0 }
  0x31   : > { %s60_s21 = scalar_select %p59_p4, %s1135_s30, %s501_s17 }
  0x32   : > { %s67_s7 = sadd.s32 1, %s793_s23  ;;  %p76_p8 = por %p75_p9, %p74_p6 }
  0x33   : > { %s61_s6 = sadd.s32 %s60_s21, %s56_s10  ;;  %p540_p12 = scmp.lt.s32.totalorder %s813_s28, 6 }
  0x34   : > { %s62_s29 = ssub.s32 %s55_s15, %s61_s6  ;;  %s132_s10 = sand.u32 1, %s793_s23  }
  0x35   : > { %p65_p10 = scmp.eq.s32.totalorder %s62_s29, 0  ;;  %p959_p13 = pnand %p540_p12, %p76_p8 }
  0x36   : > { %s520_s5 = scalar_select %p76_p8, [#allocation7], [#allocation13] }
  0x37   : > { %s955_s8 = scalar_select %p65_p10, %s793_s23, %s67_s7  }
  0x38   : > { %s521_s11 = scalar_select %p76_p8, %s809_s27, 0 }
  0x39   : > { %1110 = sst [smem:[#allocation26_spill]] %s955_s8  ;;  %s1143_s5 = smov (!%p540_p12, %s520_s5), [#allocation15] }
  0x3a   : > { %s1141_s11 = smov (!%p540_p12, %s521_s11), 0  ;;  %p508_p0 = scmp.ge.s32.totalorder %s813_s28, 1 }
  0x3b   : > { %s522_s12 = scalar_select %p76_p8, [#allocation8], [#allocation14] }
  0x3c   : > { %p157_p6 = scmp.lt.s32.totalorder %s813_s28, 7  ;;  %s504_s15 = sshll.u32 %s132_s10, 4 }
  0x3d   : > { %s1145_s12 = smov (!%p540_p12, %s522_s12), [#allocation16]  ;;  %s137_s17 = sld [smem:[%s1143_s5 + %s1141_s11]] }
  0x3e   : > { %s138_s14 = sld [smem:[%s1145_s12 + %s1141_s11]]  ;;  %p965_p9 = pnand %p508_p0, %p157_p6 }
  0x3f   : > { %s136_s7 = scalar_lea.vmem [#allocation9], %s504_s15  ;;  %s133_s16 = scalar_lea.sflag [#allocation10], %s132_s10 }
  0x40   : > { %s1112_s21 = scalar_select %p965_p9, 1, 0 }
  0x41   : > { %s152_s29 = sshll.u32 %s136_s7, 4  ;;  %p665_p3 = pneg %p959_p13  ;;  %s971_s29 = int_to_ptr.vmem [resolvable:$true] %s152_s29 }
  0x44   : > { %s505_s6 = sadd.s32 4294967295, %s138_s14  ;;  %s668_s14 = scalar_lea.hbm %s1091_s2, 1280 }
  0x45   : > { %p140_p1 = scmp.lt.s32.totalorder %s805_s26, %s505_s6 }
  0x47   : > { %s141_s4 = scalar_select %p140_p1, %s805_s26, %s505_s6 }
  0x49   : > { %s142_s30 = sadd.s32 %s141_s4, %s137_s17 }
  0x4a   : > { %s518_s27 = sshll.u32 %s142_s30, 8 }
  0x4b   : > { %s150_s23 = scalar_lea.hbm %s1091_s2, %s518_s27 }
  0x4c   : > { %s663_s20 = scalar_lea.hbm %s150_s23, 256  ;;  %p669_p10 = scmp.lt.s32.totalorder %s150_s23, %s1091_s2 }
  0x4d   : > { %p664_p2 = scmp.ne.s32.totalorder %s150_s23, %s663_s20  ;;  %p670_p12 = scmp.lt.s32.totalorder %s668_s14, %s663_s20 }
  0x4f   : > { %p666_p4 = pnand %p665_p3, %p664_p2  ;;  %p671_p0 = por %p670_p12, %p669_p10 }
  0x51   : > { %p667_p8 = pneg %p666_p4 }
  0x53   : > { %p672_p6 = pnand %p671_p0, %p667_p8 }
  0x55   : > { %675 = shalt.err (!%p672_p6)
}
  0x56   : > { %s676_s27 = scalar_lea.vmem %s971_s29, 256  ;;  %s817_s30 = smov [#allocation9]  }
  0x57   : > { %p677_p1 = scmp.ne.s32.totalorder %s971_s29, %s676_s27  ;;  %s681_s8 = sshll.u32 %s817_s30, 4  ;;  %s682_s8 = int_to_ptr.vmem [resolvable:$false] %s681_s8 }
  0x58   : > { %s683_s10 = scalar_lea.vmem %s682_s8, 512  ;;  %p684_p4 = scmp.lt.s32.totalorder %s971_s29, %s682_s8 }
  0x59   : > { %p679_p7 = pnand %p677_p1, %p665_p3  ;;  %p685_p5 = scmp.lt.s32.totalorder %s683_s10, %s676_s27 }
  0x5b   : > { %p680_p2 = pneg %p679_p7  ;;  %p686_p11 = por %p685_p5, %p684_p4 }
  0x5d   : > { %p687_p9 = pnand %p686_p11, %p680_p2 }
  0x5f   : > { %690 = shalt.err (!%p687_p9)
}
  0x60   : > { %535 = dma.hbm_to_vmem [thread:$0]  (!%p959_p13), %s150_s23, 256, %s971_s29, %s133_s16  }
  0x61   : > { %p1113_p8 = scmp.ne.s32.totalorder %s1112_s21, 0 }
  0x62   : > { %s163_s20 = sand.u32 (!%p1113_p8), 1, %s789_s22   ;;  %p1114_p7 = scmp.ne.s32.totalorder (!%p1113_p8), %s1106_s9, 0 }
  0x63   : > { %161 = sbr.rel (%p1113_p8) target bundleno = 253 (0xfd), region = 24  ;;  %s509_s17 = sshll.u32 (!%p1113_p8), %s163_s20, 4 }
  0x64   : > { %s164_s6 = scalar_lea.sflag (!%p1113_p8), [#allocation10], %s163_s20  ;;  %s993_s7 = scalar_lea.vmem (!%p1113_p8), [#allocation9], %s509_s17 }
  0x68   : > { %764 = dma.done.wait (%p1114_p7), %s164_s6, 256  }
  0x69   : > { %766 = vsyncadd (%p1114_p7), %s164_s6, 4294967040  ;;  %s183_s13 = sand.u32 1, %s777_s1   ;;  %s1001_s23 = sld [smem:[#allocation8 + %s801_s25]] }
  0x6a   : > { %s510_s16 = sshll.u32 %s183_s13, 4  ;;  %p511_p11 = scmp.ne.s32.totalorder %s797_s24, 0 }
  0x6b   : > { %s1005_s21 = scalar_lea.vmem [#allocation12], %s510_s16 }
  0x6c   : > { %198 = sbr.rel (%p511_p11) target bundleno = 137 (0x89), region = 32 }
  0x71   : > { %v199_v0 = vld [vmem:[%s993_s7] sm:$0xff]  ;;  %v200_v1 = vld [vmem:[%s993_s7 + $0x8] sm:$0xff]  ;;  %v227_v2 = vlaneseq  ;;  %v818_v8 = vmov 1.0   ;;  %v819_v13 = vmov 1966171168  }
  0x72   : > { %201 = vst [vmem:[#allocation2] sm:$0xff] %v199_v0  ;;  %v205_v3 = vmul.f32 %v199_v0, %v199_v0  ;;  %203 = vst [vmem:[#allocation3 + $0x8] sm:$0xff] %v199_v0  ;;  %v206_v4 = vmul.f32 %v200_v1, %v200_v1  ;;  %v225_v14 = vunpack.c.l.s4 %v819_v13 }
  0x73   : > { %202 = vst [vmem:[#allocation2 + $0x8] sm:$0xff] %v200_v1  ;;  %204 = vst [vmem:[#allocation3] sm:$0xff] %v200_v1  ;;  %vm1010_vm0 = vcmp.lt.s32.totalorder %v227_v2, 256  ;;  %v228_v20 = vshrl.u32 %v227_v2, 7 }
  0x74   : > { %v207_v6 = vrot.slane %v205_v3, 4  ;;  %v213_v7 = vrot.slane %v206_v4, 4  ;;  %244 = vst.msk [vmem:[#allocation5] sm:$0x3] %vm1010_vm0, %v818_v8  ;;  %v226_v19 = vunpack.c.0.s8 %v225_v14 }
  0x76   : > { %v208_v9 = vadd.f32 %v207_v6, %v205_v3  ;;  %v214_v10 = vadd.f32 %v213_v7, %v206_v4  ;;  %v229_v25 = vsub.s32 %v226_v19, %v228_v20 }
  0x78   : > { %v209_v11 = vrot.slane %v208_v9, 2  ;;  %v215_v12 = vrot.slane %v214_v10, 2 }
  0x7a   : > { %v210_v15 = vadd.f32 %v209_v11, %v208_v9  ;;  %v216_v16 = vadd.f32 %v215_v12, %v214_v10 }
  0x7c   : > { %v211_v17 = vrot.slane %v210_v15, 1  ;;  %v217_v18 = vrot.slane %v216_v16, 1 }
  0x7e   : > { %v212_v21 = vadd.f32 %v211_v17, %v210_v15  ;;  %v218_v22 = vadd.f32 %v217_v18, %v216_v16 }
  0x80   : > { %v219_v23 = vmul.f32 0.35355338, %v212_v21  ;;  %v220_v24 = vmul.f32 0.35355338, %v218_v22 }
  0x82   : > { %v223_v26 = vcombine.low %v219_v23, %v220_v24 }
  0x84   : > { %v230_v27 = vrot.slane %v223_v26, %v229_v25 }
  0x86   : > { %v237_v28 = vrot.slane %v230_v27, %v229_v25 }
  0x88   : > { %243 = vst.msk [vmem:[#allocation4] sm:$0x3] %vm1010_vm0, %v237_v28 }
  0x89 PF: > { %p245_p5 = scmp.gt.s32.totalorder %s797_s24, 0  ;;  %p246_p13 = scmp.lt.s32.totalorder %s797_s24, %s1001_s23 }
  0x8b   : > { %p247_p9 = pnand %p246_p13, %p245_p5 }
  0x8d   : > { %250 = sbr.rel (%p247_p9) target bundleno = 202 (0xca), region = 36 }
  0x92   : > { %v251_v29 = vld [vmem:[%s993_s7] sm:$0xff]  ;;  %v252_v30 = vld [vmem:[%s993_s7 + $0x8] sm:$0xff]  ;;  %v820_v41 = vmov 1966171168   ;;  %v278_v43 = vlaneseq }
  0x93   : > { %v253_v31 = vld [vmem:[#allocation2] sm:$0xff]  ;;  %v254_v32 = vld [vmem:[#allocation2 + $0x8] sm:$0xff]  ;;  %v276_v42 = vunpack.c.l.s4 %v820_v41  ;;  %v337_v8 = vld [vmem:[#allocation3 + $0x8] sm:$0xff] }
  0x94   : > { %v255_v33 = vmul.f32 %v253_v31, %v251_v29  ;;  %v256_v34 = vmul.f32 %v254_v32, %v252_v30  ;;  %v279_v49 = vshrl.u32 %v278_v43, 7  ;;  %v271_v57 = vld [vmem:[#allocation4] sm:$0x3]  ;;  %vm1023_vm1 = vcmp.lt.s32.totalorder %v278_v43, 256  ;;  %v338_v10 = vld [vmem:[#allocation3] sm:$0xff] }
  0x95   : > { %v277_v48 = vunpack.c.0.s8 %v276_v42  ;;  %v311_v14 = vld [vmem:[#allocation5] sm:$0x3] }
  0x96   : > { %v257_v35 = vrot.slane %v255_v33, 4  ;;  %v263_v36 = vrot.slane %v256_v34, 4  ;;  %v297_v59 = vsub.s32 0, %v279_v49  ;;  %v301_v60 = vsub.s32 1, %v279_v49 }
  0x97   : > { %v280_v54 = vsub.s32 %v277_v48, %v279_v49 }
  0x98   : > { %v258_v37 = vadd.f32 %v257_v35, %v255_v33  ;;  %v264_v38 = vadd.f32 %v263_v36, %v256_v34 }
  0x9a   : > { %v259_v39 = vrot.slane %v258_v37, 2  ;;  %v265_v40 = vrot.slane %v264_v38, 2 }
  0x9c   : > { %v260_v44 = vadd.f32 %v259_v39, %v258_v37  ;;  %v266_v45 = vadd.f32 %v265_v40, %v264_v38 }
  0x9e   : > { %v261_v46 = vrot.slane %v260_v44, 1  ;;  %v267_v47 = vrot.slane %v266_v45, 1 }
  0xa0   : > { %v262_v50 = vadd.f32 %v261_v46, %v260_v44  ;;  %v268_v51 = vadd.f32 %v267_v47, %v266_v45 }
  0xa2   : > { %v269_v52 = vmul.f32 0.35355338, %v262_v50  ;;  %v270_v53 = vmul.f32 0.35355338, %v268_v51 }
  0xa4   : > { %v274_v55 = vcombine.low %v269_v52, %v270_v53 }
  0xa6   : > { %v281_v56 = vrot.slane %v274_v55, %v280_v54 }
  0xa8   : > { %v288_v58 = vrot.slane %v281_v56, %v280_v54 }
  0xaa   : > { %v290_v62 = vmax.f32 %v271_v57, %v288_v58 }
  0xac   : > { %v291_v63 = vsub.f32 %v271_v57, %v290_v62  ;;  %v298_v0 = vrot.slane %v290_v62, %v297_v59  ;;  %v302_v1 = vrot.slane %v290_v62, %v301_v60  ;;  %366 = vst.msk [vmem:[#allocation4] sm:$0x3] %vm1023_vm1, %v290_v62 }
  0xae   : > { %v292_v2 = vmul.f32 1.442695, %v291_v63  ;;  %v305_v3 = vsub.f32 %v269_v52, %v298_v0  ;;  %v306_v4 = vsub.f32 %v270_v53, %v302_v1 }
  0xb0   : > { %635 = vpow2.f32 %v292_v2  ;;  %v307_v5 = vmul.f32 1.442695, %v305_v3  ;;  %v309_v6 = vmul.f32 1.442695, %v306_v4 }
  0xb2   : > { %637 = vpow2.f32 %v307_v5 }
  0xb3   : > { %639 = vpow2.f32 %v309_v6 }
  0xbd   : > { %v636_v7 = vpop.eup %635 }
  0xbe   : > { %v343_v9 = vrot.slane %v636_v7, %v297_v59  ;;  %v347_v11 = vrot.slane %v636_v7, %v301_v60  ;;  %v312_v21 = vmul.f32 %v636_v7, %v311_v14 }
  0xbf   : > { %v638_v12 = vpop.eup %637 }
  0xc0   : > { %v640_v13 = vpop.eup %639  ;;  %v350_v15 = vmul.f32 %v343_v9, %v337_v8  ;;  %v355_v16 = vrot.slane %v638_v12, %v297_v59  ;;  %v351_v18 = vmul.f32 %v347_v11, %v338_v10 }
  0xc1   : > { %v315_v17 = vcombine.low %v638_v12, %v640_v13  ;;  %v359_v19 = vrot.slane %v640_v13, %v297_v59 }
  0xc2   : > { %v360_v20 = vmul.f32 %v355_v16, %v251_v29 }
  0xc3   : > { %v322_v22 = vrot.slane %v315_v17, %v280_v54  ;;  %v361_v23 = vmul.f32 %v359_v19, %v252_v30 }
  0xc4   : > { %v362_v24 = vadd.f32 %v360_v20, %v350_v15 }
  0xc5   : > { %v329_v25 = vrot.slane %v322_v22, %v280_v54  ;;  %v363_v26 = vadd.f32 %v361_v23, %v351_v18 }
  0xc6   : > { %364 = vst [vmem:[#allocation3 + $0x8] sm:$0xff] %v362_v24 }
  0xc7   : > { %v331_v27 = vadd.f32 %v329_v25, %v312_v21  ;;  %365 = vst [vmem:[#allocation3] sm:$0xff] %v363_v26 }
  0xc9   : > { %336 = vst.msk [vmem:[#allocation5] sm:$0x3] %vm1023_vm1, %v331_v27 }
  0xca PF: > { %p512_p3 = scmp.ne.s32.totalorder %s797_s24, 2 }
  0xcc   : > { %370 = sbr.rel (%p512_p3) target bundleno = 229 (0xe5), region = 40 }
  0xd1   : > { %v373_v28 = vld [vmem:[#allocation5] sm:$0x3]  ;;  %v376_v29 = vlaneseq  ;;  %v371_v34 = vld [vmem:[#allocation3 + $0x8] sm:$0xff]  ;;  %v372_v35 = vld [vmem:[#allocation3] sm:$0xff] }
  0xd2   : > { %641 = vrcp.f32 %v373_v28 }
  0xd3   : > { %v377_v31 = vshrl.u32 %v376_v29, 7 }
  0xd5   : > { %v378_v30 = vsub.s32 0, %v377_v31  ;;  %v382_v32 = vsub.s32 1, %v377_v31 }
  0xdf   : > { %v642_v33 = vpop.eup %641 }
  0xe0   : > { %v379_v36 = vrot.slane %v642_v33, %v378_v30  ;;  %v383_v37 = vrot.slane %v642_v33, %v382_v32 }
  0xe2   : > { %v386_v38 = vmul.f32 %v379_v36, %v371_v34  ;;  %v387_v39 = vmul.f32 %v383_v37, %v372_v35 }
  0xe4   : > { %388 = vst [vmem:[%s1005_s21] sm:$0xff] %v386_v38  ;;  %389 = vst [vmem:[%s1005_s21 + $0x8] sm:$0xff] %v387_v39 }
  0xe5 PF: > { %s519_s24 = sshll.u32 %s801_s25, 8  ;;  %s407_s5 = sshll.u32 %s1005_s21, 4  ;;  %s408_s5 = int_to_ptr.vmem [resolvable:$true] %s407_s5 }
  0xe6   : > { %s405_s12 = scalar_lea.hbm %s1092_s3, %s519_s24  ;;  %s391_s11 = scalar_lea.sflag [#allocation11], %s183_s13 }
  0xe7   : > { %s691_s14 = scalar_lea.vmem %s408_s5, 256  ;;  %p1119_p12 = scmp.ne.s32.totalorder %s1108_s18, 0 }
  0xe8   : > { %p692_p10 = scmp.ne.s32.totalorder %s408_s5, %s691_s14  ;;  %s821_s15 = smov [#allocation12]  }
  0xe9   : > { %s695_s4 = sshll.u32 %s821_s15, 4  ;;  %s696_s4 = int_to_ptr.vmem [resolvable:$false] %s695_s4 }
  0xea   : > { %p693_p0 = pnand %p692_p10, %p1119_p12  ;;  %s697_s27 = scalar_lea.vmem %s696_s4, 512 }
  0xeb   : > { %p698_p1 = scmp.lt.s32.totalorder %s408_s5, %s696_s4  ;;  %p699_p2 = scmp.lt.s32.totalorder %s697_s27, %s691_s14 }
  0xec   : > { %p694_p6 = pneg %p693_p0 }
  0xed   : > { %p700_p4 = por %p699_p2, %p698_p1 }
  0xef   : > { %p701_p8 = pnand %p700_p4, %p694_p6 }
  0xf1   : > { %704 = shalt.err (!%p701_p8)
}
  0xf2   : > { %s705_s25 = scalar_lea.hbm %s405_s12, 256  ;;  %s709_s10 = scalar_lea.hbm %s1092_s3, 512 }
  0xf3   : > { %p706_p7 = scmp.ne.s32.totalorder %s405_s12, %s705_s25  ;;  %p710_p13 = scmp.lt.s32.totalorder %s405_s12, %s1092_s3 }
  0xf4   : > { %p711_p9 = scmp.lt.s32.totalorder %s709_s10, %s705_s25 }
  0xf5   : > { %p707_p11 = pnand %p706_p7, %p1119_p12 }
  0xf6   : > { %p712_p3 = por %p711_p9, %p710_p13 }
  0xf7   : > { %p708_p5 = pneg %p707_p11 }
  0xf9   : > { %p713_p10 = pnand %p712_p3, %p708_p5 }
  0xfb   : > { %716 = shalt.err (!%p713_p10)
}
  0xfc   : > { %526 = dma.vmem_to_hbm [thread:$0]  (%p1119_p12), %s408_s5, 256, %s405_s12, %s391_s11  }
  0xfd PF: > { %p541_p0 = scmp.ge.s32.totalorder %s813_s28, 2  ;;  %s419_s6 = sand.u32 1, %s773_s0  }
  0xfe   : > { %p1120_p6 = scmp.ne.s32.totalorder %s1109_s19, 0  ;;  %s420_s7 = scalar_lea.sflag [#allocation11], %s419_s6 }
 0x100   : > { %p537_p1 = pnand %p541_p0, %p1120_p6 }
 0x102   : > { %p538_p2 = pneg %p537_p1 }
 0x104   : > { %768 = dma.done.wait (%p538_p2), %s420_s7, 256  }
 0x105   : > { %770 = vsyncadd (%p538_p2), %s420_s7, 4294967040  ;;  %s27_s28 = sadd.s32 1, %s813_s28   ;;  %s1121_s13 = sld [smem:[#allocation20_spill]] }
 0x106   : > { %p24_p4 = scmp.ge.s32.totalorder %s27_s28, 8   ;;  %s1122_s20 = sld [smem:[#allocation25_spill]] }
 0x107   : > { %s1123_s18 = sld [smem:[#allocation21_spill]]  ;;  %s1128_s0 = smov %s777_s1 }
 0x108   : > { %s1124_s23 = sld [smem:[#allocation26_spill]]  ;;  %s1130_s21 = smov %s789_s22 }
 0x109   : > { %s1125_s25 = sld [smem:[#allocation22_spill]]  ;;  %s1132_s24 = smov %s805_s26 }
 0x10a   : > { %s1126_s16 = sld [smem:[#allocation23_spill]] }
 0x10b   : > { %s1127_s27 = sld [smem:[#allocation24_spill]]  ;;  %s1129_s1 = smov %s1121_s13 }
 0x10c   :  { %26 = sbr.rel (!%p24_p4) target bundleno = 25 (0x19), region = 81 }
 0x10d   : > { %s1131_s22 = smov %s1123_s18 }
 0x110   : > { %s1133_s26 = smov %s1126_s16 }
 0x111   :  { %425 = vsyncpa [#allocation10], 1 }
 0x112   :  { %427 = vsyncpa [#allocation10 + $0x1], 1 }
 0x113   :  { %428 = vsyncpa [#allocation11], 1 }
 0x114   :  { %430 = vsyncpa [#allocation11 + $0x1], 1 }

</bundles_post_ra>
